<compile_context>
chip_gen: v6e
topology: v6e:2x2x1
jax: 0.10.0
libtpu: 0.0.40
codegen_flags: <defaults>
</compile_context>

<pallas_src>
import functools

import jax
import jax.numpy as jnp
from jax.experimental import pallas as pl
from jax.experimental.pallas import tpu as pltpu


def avg_pooling_kernel(ids_ref, w_ref, b1_ref, w2_ref, b2_ref, out_ref,
                       acc_ref, cnt_ref, *,
                       seq_block, batch_block, padding_idx, nclasses, voc_size):
    i = pl.program_id(0)          # batch-block index  ("parallel")
    j = pl.program_id(1)          # sequence-block index ("arbitrary" reduction)
    hdim = w_ref.shape[1]

    @pl.when(j == 0)
    def _init():
        acc_ref[...] = jnp.zeros_like(acc_ref)
        cnt_ref[...] = jnp.zeros_like(cnt_ref)

    col_base = j * seq_block
    # 2-4 independent accumulation chains (register-carried) -> ILP in the
    # gather loop; fewer chains for large H to limit vreg pressure.
    n_chains = 4 if hdim <= 512 else 2
    n_chunks = seq_block // n_chains
    rem = seq_block - n_chains * n_chunks          # 0 .. n_chains-1 (static)

    def gather_token(row, col):
        tok = ids_ref[row, col]                              # SMEM scalar read
        valid = (tok != padding_idx).astype(jnp.float32)     # masked_fill_(mask, 0)
        safe = jnp.clip(tok, 0, voc_size - 1)                # no OOB VMEM gather
        return w_ref[pl.ds(safe, 1), :] * valid, valid       # (1, H), ()

    def row_body(b_loc, carry):
        row = i * batch_block + b_loc

        def chunk_body(q, state):
            accs, cnts = state
            col0 = col_base + n_chains * q
            new_accs, new_cnts = [], []
            for c in range(n_chains):                        # static unroll
                contrib, v = gather_token(row, col0 + c)
                new_accs.append(accs[c] + contrib)
                new_cnts.append(cnts[c] + v)
            return tuple(new_accs), tuple(new_cnts)

        zero_vec = jnp.zeros((1, hdim), jnp.float32)
        zero_scl = jnp.zeros((), jnp.float32)
        accs, cnts = jax.lax.fori_loop(
            0, n_chunks, chunk_body,
            (tuple(zero_vec for _ in range(n_chains)),
             tuple(zero_scl for _ in range(n_chains))),
            unroll=max(1, min(4, n_chunks)))

        acc_row = accs[0]
        cnt_row = cnts[0]
        for c in range(1, n_chains):
            acc_row = acc_row + accs[c]
            cnt_row = cnt_row + cnts[c]
        for r in range(rem):                                 # static remainder
            contrib, v = gather_token(row, col_base + n_chains * n_chunks + r)
            acc_row = acc_row + contrib
            cnt_row = cnt_row + v

        # Single VMEM update per batch row per grid step (was per token).
        acc_ref[pl.ds(b_loc, 1), :] += acc_row
        cnt_ref[pl.ds(b_loc, 1), :] += jnp.reshape(cnt_row, (1, 1))
        return carry

    jax.lax.fori_loop(0, batch_block, row_body, 0)

    # --- finalize on the last sequence block: average, classifier, log_softmax ---
    @pl.when(j == pl.num_programs(1) - 1)
    def _finalize():
        lens = jnp.maximum(cnt_ref[...], 1.0)                # (BB, 1), guard all-pad cols
        # sum_s((W[tok]+b1)*valid)/lens == acc/lens + b1  (exact identity)
        hiddens = acc_ref[...] * pl.reciprocal(lens) + b1_ref[...]            # (BB, H)
        logits = jnp.dot(hiddens, w2_ref[...],
                         preferred_element_type=jnp.float32) + b2_ref[...]    # (BB, Cp)
        lane = jax.lax.broadcasted_iota(jnp.int32, logits.shape, 1)
        logits = jnp.where(lane < nclasses, logits, -1e30)   # mask padded classes
        m = jnp.max(logits, axis=-1, keepdims=True)
        lse = m + jnp.log(jnp.sum(jnp.exp(logits - m), axis=-1, keepdims=True))
        out_ref[...] = logits - lse


def prepare_avg_pooling_params(emb, w1, b1, w2, b2):
    """One-time preprocessing (hoisted out of the per-call forward).

    Fuses embedding and first linear: (onehot @ emb) @ w1 == onehot @ (emb @ w1),
    and zero-pads the class dimension to a multiple of 128 lanes so the
    classifier matmul / final store are lane-dense.
    """
    voc_size, _ = emb.shape
    hdim = w1.shape[1]
    nclasses = w2.shape[1]
    c_pad = ((nclasses + 127) // 128) * 128

    w_fused = jnp.dot(emb, w1, precision=jax.lax.Precision.HIGHEST)        # (V, H)
    w_fused = w_fused.astype(jnp.float32)
    w2_p = jnp.zeros((hdim, c_pad), jnp.float32).at[:, :nclasses].set(w2)
    b2_p = jnp.zeros((1, c_pad), jnp.float32).at[:, :nclasses].set(b2)
    b1_r = b1.reshape(1, hdim).astype(jnp.float32)
    return dict(w_fused=w_fused, b1=b1_r, w2_p=w2_p, b2_p=b2_p,
                voc_size=voc_size, hdim=hdim, nclasses=nclasses, c_pad=c_pad)


def avg_pooling_forward(ids, params, *, padding_idx,
                        seq_block=None, batch_block=None):
    seq_len, bsz = ids.shape
    voc_size = params["voc_size"]
    hdim = params["hdim"]
    nclasses = params["nclasses"]
    c_pad = params["c_pad"]
    w_fused, b1_r, w2_p, b2_p = (params["w_fused"], params["b1"],
                                 params["w2_p"], params["b2_p"])

    seq_block = seq_len if seq_block is None else seq_block
    if batch_block is None:
        # >=2 batch blocks when bsz allows -> the "parallel" axis can split
        # across v7x's two TensorCores; larger blocks also feed the 256-wide
        # MXU better on v6e/v7x.
        batch_block = bsz // 2 if (bsz % 16 == 0) else bsz
    assert seq_len % seq_block == 0 and bsz % batch_block == 0
    assert batch_block == bsz or batch_block % 8 == 0, \
        "batch_block must be a multiple of 8 (sublane tiling) unless it spans the whole batch"

    # Explicit VMEM budget: resident weights (double-buffered), output block,
    # scratch, plus headroom.  v5e's scoped default is only 16 MiB.
    weight_bytes = 4 * (int(w_fused.size) + int(w2_p.size)
                        + int(b1_r.size) + int(b2_p.size))
    work_bytes = 4 * (2 * batch_block * c_pad + batch_block * hdim + batch_block)
    vmem_limit = int(min(100 * 2**20,
                         max(32 * 2**20, 2 * weight_bytes + work_bytes + (2 << 20))))

    kernel = functools.partial(
        avg_pooling_kernel, seq_block=seq_block, batch_block=batch_block,
        padding_idx=padding_idx, nclasses=nclasses, voc_size=voc_size)

    grid = (bsz // batch_block, seq_len // seq_block)
    grid_spec = pltpu.PrefetchScalarGridSpec(
        num_scalar_prefetch=1,                                  # (bsz, seq_len) id table -> SMEM
        grid=grid,
        in_specs=[
            pl.BlockSpec((voc_size, hdim), lambda i, j, ids: (0, 0)),  # fused W (resident)
            pl.BlockSpec((1, hdim),        lambda i, j, ids: (0, 0)),  # b1
            pl.BlockSpec((hdim, c_pad),    lambda i, j, ids: (0, 0)),  # w2 (padded)
            pl.BlockSpec((1, c_pad),       lambda i, j, ids: (0, 0)),  # b2 (padded)
        ],
        out_specs=pl.BlockSpec((batch_block, c_pad), lambda i, j, ids: (i, 0)),
        scratch_shapes=[pltpu.VMEM((batch_block, hdim), jnp.float32),  # hidden sum
                        pltpu.VMEM((batch_block, 1), jnp.float32)],    # token counts
    )

    out = pl.pallas_call(
        kernel,
        out_shape=jax.ShapeDtypeStruct((bsz, c_pad), jnp.float32),
        grid_spec=grid_spec,
        compiler_params=pltpu.CompilerParams(
            dimension_semantics=("parallel", "arbitrary"),
            vmem_limit_bytes=vmem_limit),
    )(
        jnp.asarray(ids, jnp.int32).T,          # (bsz, seq_len) id table, scalar-prefetched
        w_fused,
        b1_r,
        w2_p,
        b2_p,
    )
    return out[:, :nclasses]


def avg_pooling_reference(ids, emb, w1, b1, w2, b2, *, padding_idx):
    seq_len, _ = ids.shape
    embs = emb[ids]                                                   # (S, B, E)
    affine = jnp.einsum('sbe,eh->sbh', embs, w1,
                        precision=jax.lax.Precision.HIGHEST) + b1     # (S, B, H)
    mask = (ids == padding_idx)
    affine = jnp.where(mask[..., None], 0.0, affine)
    lens = (seq_len - mask.sum(axis=0)).astype(jnp.float32)
    hiddens = affine.sum(axis=0) / lens[:, None]
    logits = jnp.dot(hiddens, w2, precision=jax.lax.Precision.HIGHEST) + b2
    return jax.nn.log_softmax(logits, axis=-1)


if __name__ == "__main__":
    # module hyper-params (edim == hdim, as implied by masked_fill_ broadcasting
    # in the original PyTorch forward)
    voc_size, edim, hdim, nclasses = 50, 32, 32, 5
    padding_idx = 0
    seq_len, bsz = 8, 8

    key = jax.random.PRNGKey(0)
    k_ids, k_emb, k_w1, k_b1, k_w2, k_b2 = jax.random.split(key, 6)

    # deterministic synthetic parameters
    emb = 0.1 * jax.random.normal(k_emb, (voc_size, edim), jnp.float32)
    emb = emb.at[padding_idx].set(0.0)                   # padding_idx row zeroed
    w1 = 0.1 * jax.random.normal(k_w1, (edim, hdim), jnp.float32)
    b1 = 0.1 * jax.random.normal(k_b1, (hdim,), jnp.float32)
    w2 = 0.1 * jax.random.normal(k_w2, (hdim, nclasses), jnp.float32)
    b2 = 0.1 * jax.random.normal(k_b2, (nclasses,), jnp.float32)

    # token ids with ragged padding (every column keeps >= 1 real token)
    ids = jax.random.randint(k_ids, (seq_len, bsz), 1, voc_size, jnp.int32)
    lengths = jnp.array([8, 7, 6, 5, 8, 4, 3, 2], dtype=jnp.int32)
    s_iota = jnp.arange(seq_len, dtype=jnp.int32)[:, None]
    ids = jnp.where(s_iota < lengths[None, :], ids, padding_idx)

    # One-time parameter preparation (fused table + class padding), hoisted out
    # of the per-step forward.
    params = prepare_avg_pooling_params(emb, w1, b1, w2, b2)

    # seq_block=4 exercises the multi-step reduction (accumulator + pl.when) path
    out = avg_pooling_forward(ids, params, padding_idx=padding_idx, seq_block=4)
    out = jax.block_until_ready(out)

    ref = avg_pooling_reference(ids, emb, w1, b1, w2, b2, padding_idx=padding_idx)
    assert out.shape == (bsz, nclasses)
    assert jnp.allclose(out, ref, rtol=1e-5, atol=1e-5), (out, ref)

    print("KERNEL_OK")
</pallas_src>

<mosaic_0001>
module attributes {stable_mosaic.version = 11 : i64} {
  func.func @avg_pooling_kernel(%arg0: i32, %arg1: i32, %arg2: memref<8x8xi32, #tpu.memory_space<smem>>, %arg3: memref<50x32xf32, #tpu.memory_space<vmem>>, %arg4: memref<1x32xf32, #tpu.memory_space<vmem>>, %arg5: memref<32x128xf32, #tpu.memory_space<vmem>>, %arg6: memref<1x128xf32, #tpu.memory_space<vmem>>, %arg7: memref<8x128xf32, #tpu.memory_space<vmem>>, %arg8: memref<8x32xf32, #tpu.memory_space<vmem>>, %arg9: memref<8x1xf32, #tpu.memory_space<vmem>>) attributes {dimension_semantics = [#tpu.dimension_semantics<parallel>, #tpu.dimension_semantics<arbitrary>], iteration_bounds = array<i64: 1, 2>, scalar_prefetch = 1 : i64, scratch_operands = 2 : i64, tpu.core_type = #tpu.core_type<tc>, window_params = [{pipeline_mode = #tpu.pipeline_mode<synchronous>, transform_indices = @transform_0, window_bounds = array<i64: 50, 32>}, {pipeline_mode = #tpu.pipeline_mode<synchronous>, transform_indices = @transform_1, window_bounds = array<i64: 1, 32>}, {pipeline_mode = #tpu.pipeline_mode<synchronous>, transform_indices = @transform_2, window_bounds = array<i64: 32, 128>}, {pipeline_mode = #tpu.pipeline_mode<synchronous>, transform_indices = @transform_3, window_bounds = array<i64: 1, 128>}, {transform_indices = @transform_4, window_bounds = array<i64: 8, 128>}]} {
    %c0_i32 = arith.constant 0 : i32
    %0 = arith.cmpi eq, %arg1, %c0_i32 : i32
    %1 = arith.extui %0 : i1 to i32
    %c0_i32_0 = arith.constant 0 : i32
    %2 = arith.cmpi ne, %1, %c0_i32_0 : i32
    scf.if %2 {
      %cst = arith.constant 0.000000e+00 : f32
      %8 = vector.broadcast %cst : f32 to vector<8x32xf32>
      %c0 = arith.constant 0 : index
      %c0_5 = arith.constant 0 : index
      %9 = vector.load %arg8[%c0, %c0_5] : memref<8x32xf32, #tpu.memory_space<vmem>>, vector<8x32xf32>
      tpu.vector_store %arg8[%c0, %c0_5], %8 {strides = array<i32>} : memref<8x32xf32, #tpu.memory_space<vmem>>, vector<8x32xf32>,
      %cst_6 = arith.constant 0.000000e+00 : f32
      %10 = vector.broadcast %cst_6 : f32 to vector<8x1xf32>
      %c0_7 = arith.constant 0 : index
      %c0_8 = arith.constant 0 : index
      %11 = vector.load %arg9[%c0_7, %c0_8] : memref<8x1xf32, #tpu.memory_space<vmem>>, vector<8x1xf32>
      tpu.vector_store %arg9[%c0_7, %c0_8], %10 {strides = array<i32>} : memref<8x1xf32, #tpu.memory_space<vmem>>, vector<8x1xf32>,
    } else {
    }
    %c4_i32 = arith.constant 4 : i32
    %3 = arith.muli %arg1, %c4_i32 : i32
    %c0_i32_1 = arith.constant 0 : i32
    %c8_i32 = arith.constant 8 : i32
    %4 = arith.addi %c0_i32_1, %c8_i32 : i32
    %c1_i32 = arith.constant 1 : i32
    scf.for %arg10 = %c0_i32_1 to %4 step %c1_i32  : i32 {
      %c8_i32_5 = arith.constant 8 : i32
      %8 = arith.muli %arg0, %c8_i32_5 : i32
      %9 = arith.addi %8, %arg10 : i32
      %cst = arith.constant 0.000000e+00 : f32
      %10 = vector.broadcast %cst : f32 to vector<1x32xf32>
      %cst_6 = arith.constant 0.000000e+00 : f32
      %cst_7 = arith.constant 0.000000e+00 : f32
      %cst_8 = arith.constant 0.000000e+00 : f32
      %cst_9 = arith.constant 0.000000e+00 : f32
      %c0_i32_10 = arith.constant 0 : i32
      %c4_i32_11 = arith.constant 4 : i32
      %11 = arith.muli %c4_i32_11, %c0_i32_10 : i32
      %12 = arith.addi %3, %11 : i32
      %c0_i32_12 = arith.constant 0 : i32
      %13 = arith.addi %12, %c0_i32_12 : i32
      %14 = arith.index_cast %9 : i32 to index
      %15 = arith.index_cast %13 : i32 to index
      %16 = memref.load %arg2[%14, %15] : memref<8x8xi32, #tpu.memory_space<smem>>
      %c0_i32_13 = arith.constant 0 : i32
      %17 = arith.cmpi ne, %16, %c0_i32_13 : i32
      %18 = arith.extui %17 : i1 to i32
      %19 = arith.sitofp %18 : i32 to f32
      %c0_i32_14 = arith.constant 0 : i32
      %c49_i32 = arith.constant 49 : i32
      %20 = arith.maxsi %c0_i32_14, %16 : i32
      %21 = arith.minsi %c49_i32, %20 : i32
      %22 = arith.index_cast %21 : i32 to index
      %c0 = arith.constant 0 : index
      %23 = vector.load %arg3[%22, %c0] : memref<50x32xf32, #tpu.memory_space<vmem>>, vector<1x32xf32>
      %24 = vector.broadcast %19 : f32 to vector<1x32xf32>
      %25 = arith.mulf %23, %24 : vector<1x32xf32>
      %26 = arith.addf %10, %25 : vector<1x32xf32>
      %27 = arith.addf %cst_6, %19 : f32
      %c1_i32_15 = arith.constant 1 : i32
      %28 = arith.addi %12, %c1_i32_15 : i32
      %29 = arith.index_cast %9 : i32 to index
      %30 = arith.index_cast %28 : i32 to index
      %31 = memref.load %arg2[%29, %30] : memref<8x8xi32, #tpu.memory_space<smem>>
      %c0_i32_16 = arith.constant 0 : i32
      %32 = arith.cmpi ne, %31, %c0_i32_16 : i32
      %33 = arith.extui %32 : i1 to i32
      %34 = arith.sitofp %33 : i32 to f32
      %c0_i32_17 = arith.constant 0 : i32
      %c49_i32_18 = arith.constant 49 : i32
      %35 = arith.maxsi %c0_i32_17, %31 : i32
      %36 = arith.minsi %c49_i32_18, %35 : i32
      %37 = arith.index_cast %36 : i32 to index
      %c0_19 = arith.constant 0 : index
      %38 = vector.load %arg3[%37, %c0_19] : memref<50x32xf32, #tpu.memory_space<vmem>>, vector<1x32xf32>
      %39 = vector.broadcast %34 : f32 to vector<1x32xf32>
      %40 = arith.mulf %38, %39 : vector<1x32xf32>
      %41 = arith.addf %10, %40 : vector<1x32xf32>
      %42 = arith.addf %cst_7, %34 : f32
      %c2_i32 = arith.constant 2 : i32
      %43 = arith.addi %12, %c2_i32 : i32
      %44 = arith.index_cast %9 : i32 to index
      %45 = arith.index_cast %43 : i32 to index
      %46 = memref.load %arg2[%44, %45] : memref<8x8xi32, #tpu.memory_space<smem>>
      %c0_i32_20 = arith.constant 0 : i32
      %47 = arith.cmpi ne, %46, %c0_i32_20 : i32
      %48 = arith.extui %47 : i1 to i32
      %49 = arith.sitofp %48 : i32 to f32
      %c0_i32_21 = arith.constant 0 : i32
      %c49_i32_22 = arith.constant 49 : i32
      %50 = arith.maxsi %c0_i32_21, %46 : i32
      %51 = arith.minsi %c49_i32_22, %50 : i32
      %52 = arith.index_cast %51 : i32 to index
      %c0_23 = arith.constant 0 : index
      %53 = vector.load %arg3[%52, %c0_23] : memref<50x32xf32, #tpu.memory_space<vmem>>, vector<1x32xf32>
      %54 = vector.broadcast %49 : f32 to vector<1x32xf32>
      %55 = arith.mulf %53, %54 : vector<1x32xf32>
      %56 = arith.addf %10, %55 : vector<1x32xf32>
      %57 = arith.addf %cst_8, %49 : f32
      %c3_i32 = arith.constant 3 : i32
      %58 = arith.addi %12, %c3_i32 : i32
      %59 = arith.index_cast %9 : i32 to index
      %60 = arith.index_cast %58 : i32 to index
      %61 = memref.load %arg2[%59, %60] : memref<8x8xi32, #tpu.memory_space<smem>>
      %c0_i32_24 = arith.constant 0 : i32
      %62 = arith.cmpi ne, %61, %c0_i32_24 : i32
      %63 = arith.extui %62 : i1 to i32
      %64 = arith.sitofp %63 : i32 to f32
      %c0_i32_25 = arith.constant 0 : i32
      %c49_i32_26 = arith.constant 49 : i32
      %65 = arith.maxsi %c0_i32_25, %61 : i32
      %66 = arith.minsi %c49_i32_26, %65 : i32
      %67 = arith.index_cast %66 : i32 to index
      %c0_27 = arith.constant 0 : index
      %68 = vector.load %arg3[%67, %c0_27] : memref<50x32xf32, #tpu.memory_space<vmem>>, vector<1x32xf32>
      %69 = vector.broadcast %64 : f32 to vector<1x32xf32>
      %70 = arith.mulf %68, %69 : vector<1x32xf32>
      %71 = arith.addf %10, %70 : vector<1x32xf32>
      %72 = arith.addf %cst_9, %64 : f32
      %c1_i32_28 = arith.constant 1 : i32
      %73 = arith.addf %26, %41 : vector<1x32xf32>
      %74 = arith.addf %27, %42 : f32
      %75 = arith.addf %73, %56 : vector<1x32xf32>
      %76 = arith.addf %74, %57 : f32
      %77 = arith.addf %75, %71 : vector<1x32xf32>
      %78 = arith.addf %76, %72 : f32
      %79 = arith.index_cast %arg10 : i32 to index
      %c0_29 = arith.constant 0 : index
      %80 = vector.load %arg8[%79, %c0_29] : memref<8x32xf32, #tpu.memory_space<vmem>>, vector<1x32xf32>
      %81 = arith.addf %80, %77 : vector<1x32xf32>
      %82 = arith.index_cast %arg10 : i32 to index
      %c0_30 = arith.constant 0 : index
      %83 = vector.load %arg8[%82, %c0_30] : memref<8x32xf32, #tpu.memory_space<vmem>>, vector<1x32xf32>
      tpu.vector_store %arg8[%82, %c0_30], %81 {strides = array<i32>} : memref<8x32xf32, #tpu.memory_space<vmem>>, vector<1x32xf32>,
      %84 = arith.index_cast %arg10 : i32 to index
      %c0_31 = arith.constant 0 : index
      %85 = vector.load %arg9[%84, %c0_31] : memref<8x1xf32, #tpu.memory_space<vmem>>, vector<1x1xf32>
      %86 = vector.broadcast %78 : f32 to vector<1x1xf32>
      %87 = arith.addf %85, %86 : vector<1x1xf32>
      %88 = arith.index_cast %arg10 : i32 to index
      %c0_32 = arith.constant 0 : index
      %89 = vector.load %arg9[%88, %c0_32] : memref<8x1xf32, #tpu.memory_space<vmem>>, vector<1x1xf32>
      tpu.vector_store %arg9[%88, %c0_32], %87 {strides = array<i32>} : memref<8x1xf32, #tpu.memory_space<vmem>>, vector<1x1xf32>,
    }
    %c8_i32_2 = arith.constant 8 : i32
    %c1_i32_3 = arith.constant 1 : i32
    %5 = arith.cmpi eq, %arg1, %c1_i32_3 : i32
    %6 = arith.extui %5 : i1 to i32
    %c0_i32_4 = arith.constant 0 : i32
    %7 = arith.cmpi ne, %6, %c0_i32_4 : i32
    scf.if %7 {
      %c0 = arith.constant 0 : index
      %c0_5 = arith.constant 0 : index
      %8 = vector.load %arg9[%c0, %c0_5] : memref<8x1xf32, #tpu.memory_space<vmem>>, vector<8x1xf32>
      %cst = arith.constant 1.000000e+00 : f32
      %9 = vector.broadcast %cst : f32 to vector<8x1xf32>
      %10 = arith.maximumf %8, %9 : vector<8x1xf32>
      %c0_6 = arith.constant 0 : index
      %c0_7 = arith.constant 0 : index
      %11 = vector.load %arg8[%c0_6, %c0_7] : memref<8x32xf32, #tpu.memory_space<vmem>>, vector<8x32xf32>
      %12 = tpu.reciprocal %10 : vector<8x1xf32> -> vector<8x1xf32>
      %13 = vector.broadcast %12 : vector<8x1xf32> to vector<8x32xf32>
      %14 = arith.mulf %11, %13 : vector<8x32xf32>
      %c0_8 = arith.constant 0 : index
      %c0_9 = arith.constant 0 : index
      %15 = vector.load %arg4[%c0_8, %c0_9] : memref<1x32xf32, #tpu.memory_space<vmem>>, vector<1x32xf32>
      %16 = vector.broadcast %15 : vector<1x32xf32> to vector<8x32xf32>
      %17 = arith.addf %14, %16 : vector<8x32xf32>
      %c0_10 = arith.constant 0 : index
      %c0_11 = arith.constant 0 : index
      %18 = vector.load %arg5[%c0_10, %c0_11] : memref<32x128xf32, #tpu.memory_space<vmem>>, vector<32x128xf32>
      %cst_12 = arith.constant dense<0.000000e+00> : vector<8x128xf32>
      %19 = tpu.matmul %17, %18, %cst_12 {dimension_numbers = #tpu.dot_dimension_numbers<[1], [0], [0], [1], [0, 0, 1, 1], [], []>} : vector<8x32xf32>, vector<32x128xf32>, vector<8x128xf32> -> vector<8x128xf32>
      %c0_13 = arith.constant 0 : index
      %c0_14 = arith.constant 0 : index
      %20 = vector.load %arg6[%c0_13, %c0_14] : memref<1x128xf32, #tpu.memory_space<vmem>>, vector<1x128xf32>
      %21 = vector.broadcast %20 : vector<1x128xf32> to vector<8x128xf32>
      %22 = arith.addf %19, %21 : vector<8x128xf32>
      %23 = tpu.iota {dimensions = array<i32: 1>} : vector<8x128xi32>
      %c5_i32 = arith.constant 5 : i32
      %24 = vector.broadcast %c5_i32 : i32 to vector<8x128xi32>
      %25 = arith.cmpi slt, %23, %24 : vector<8x128xi32>
      %cst_15 = arith.constant -1.000000e+30 : f32
      %26 = vector.broadcast %cst_15 : f32 to vector<8x128xf32>
      %27 = arith.select %25, %22, %26 : vector<8x128xi1>, vector<8x128xf32>
      %cst_16 = arith.constant dense<0xFF800000> : vector<8xf32>
      %28 = vector.multi_reduction <maximumf>, %27, %cst_16 [1] : vector<8x128xf32> to vector<8xf32>
      %29 = vector.shape_cast %28 : vector<8xf32> to vector<8x1xf32>
      %30 = vector.broadcast %29 : vector<8x1xf32> to vector<8x128xf32>
      %31 = arith.subf %27, %30 : vector<8x128xf32>
      %32 = math.exp %31 : vector<8x128xf32>
      %cst_17 = arith.constant dense<0.000000e+00> : vector<8xf32>
      %33 = vector.multi_reduction <add>, %32, %cst_17 [1] : vector<8x128xf32> to vector<8xf32>
      %34 = vector.shape_cast %33 : vector<8xf32> to vector<8x1xf32>
      %35 = math.log %34 : vector<8x1xf32>
      %36 = arith.addf %29, %35 : vector<8x1xf32>
      %37 = vector.broadcast %36 : vector<8x1xf32> to vector<8x128xf32>
      %38 = arith.subf %27, %37 : vector<8x128xf32>
      %c0_18 = arith.constant 0 : index
      %c0_19 = arith.constant 0 : index
      %39 = vector.load %arg7[%c0_18, %c0_19] : memref<8x128xf32, #tpu.memory_space<vmem>>, vector<8x128xf32>
      tpu.vector_store %arg7[%c0_18, %c0_19], %38 {strides = array<i32>} : memref<8x128xf32, #tpu.memory_space<vmem>>, vector<8x128xf32>,
    } else {
    }
    return
  }
  func.func @transform_0(%arg0: i32, %arg1: i32, %arg2: memref<8x8xi32, #tpu.memory_space<smem>>) -> (i32, i32) {
    %c0_i32 = arith.constant 0 : i32
    %c0_i32_0 = arith.constant 0 : i32
    %c0_i32_1 = arith.constant 0 : i32
    return %c0_i32, %c0_i32_0 : i32, i32
  }
  func.func @transform_1(%arg0: i32, %arg1: i32, %arg2: memref<8x8xi32, #tpu.memory_space<smem>>) -> (i32, i32) {
    %c0_i32 = arith.constant 0 : i32
    %c0_i32_0 = arith.constant 0 : i32
    %c0_i32_1 = arith.constant 0 : i32
    return %c0_i32, %c0_i32_0 : i32, i32
  }
  func.func @transform_2(%arg0: i32, %arg1: i32, %arg2: memref<8x8xi32, #tpu.memory_space<smem>>) -> (i32, i32) {
    %c0_i32 = arith.constant 0 : i32
    %c0_i32_0 = arith.constant 0 : i32
    %c0_i32_1 = arith.constant 0 : i32
    return %c0_i32, %c0_i32_0 : i32, i32
  }
  func.func @transform_3(%arg0: i32, %arg1: i32, %arg2: memref<8x8xi32, #tpu.memory_space<smem>>) -> (i32, i32) {
    %c0_i32 = arith.constant 0 : i32
    %c0_i32_0 = arith.constant 0 : i32
    %c0_i32_1 = arith.constant 0 : i32
    return %c0_i32, %c0_i32_0 : i32, i32
  }
  func.func @transform_4(%arg0: i32, %arg1: i32, %arg2: memref<8x8xi32, #tpu.memory_space<smem>>) -> (i32, i32) {
    %c0_i32 = arith.constant 0 : i32
    %c0_i32_0 = arith.constant 0 : i32
    return %arg0, %c0_i32 : i32, i32
  }
}

</mosaic_0001>

<bundles_post_ra>
// kernel: tpu_custom_call.1
= control target key start
LH: loop header
LB: loop body
LE: loop exit
PB: predicated region body
PF: predicated region fallthrough
CT: control target
= control target key end

     0   :  { %s825_s0 = inlined_call_operand.vmem [shape: s32[8,8], index: 0, kind: input, shape index: {}]   ;;  %s826_s1 = inlined_call_operand.vmem [shape: f32[50,32], index: 1, kind: input, shape index: {}]   ;;  %s827_s2 = inlined_call_operand.vmem [shape: f32[1,32], index: 2, kind: input, shape index: {}]   ;;  %s828_s3 = inlined_call_operand.vmem [shape: f32[32,128], index: 3, kind: input, shape index: {}]   ;;  %s829_s4 = inlined_call_operand.vmem [shape: f32[1,128], index: 4, kind: input, shape index: {}]   ;;  %s830_s5 = inlined_call_operand.hbm [shape: f32[8,128], index: 5, kind: output, shape index: {}]  }
   0x1   :  { %s10_s20 = sshll.u32 %s825_s0, 4  ;;  %s11_s20 = int_to_ptr.vmem [resolvable:$true] %s10_s20 }
   0x2   :  { %s602_s21 = scalar_lea.vmem %s11_s20, 128  ;;  %p607_p1 = scmp.lt.s32.totalorder %s11_s20, %s11_s20 }
   0x3   :  { %p603_p0 = scmp.ne.s32.totalorder %s11_s20, %s602_s21  ;;  %p608_p2 = scmp.lt.s32.totalorder %s602_s21, %s602_s21 }
   0x5   :  { %p609_p3 = por %p608_p2, %p607_p1 }
   0x7   :  { %p610_p4 = pnand %p609_p3, %p603_p0 }
   0x9   :  { %613 = shalt.err (!%p610_p4)  }
   0xa   :  { %s676_s22 = smov [#allocation5]  }
   0xb   :  { %13 = dma.vmem_to_smem %s11_s20, 128, %s676_s22, [#allocation4] }
   0xc   :  { %654 = dma.done.wait [#allocation4], 128 }
   0xd   :  { %655 = vsyncadd [#allocation4], 4294967168 }
   0xe   :  { %15 = sfence }
   0xf   :  { %16 = vsyncpa [#allocation7], 0  ;;  %s715_s23 = smov 0   ;;  %s717_s24 = smov 0  }
  0x10   :  { %s719_s25 = smov 0  }
  0x11 LB: > { %s31_s26 = sadd.s32 1, %s666_s24  ;;  %p492_p6 = scmp.ge.s32.totalorder %s670_s25, 1  ;;  %s670_s25 = sphi %s719_s25, %s22_s25   ;;  %s666_s24 = sphi %s717_s24, %s837_s24   ;;  %s662_s23 = sphi %s715_s23, %s836_s23  }
  0x12   : > { %p32_p5 = scmp.ge.s32.totalorder %s31_s26, 2  ;;  %p172_p7 = scmp.lt.s32.totalorder %s670_s25, 3 }
  0x14   : > { %s839_s26 = smov (%p32_p5, %s31_s26), 0  ;;  %p173_p8 = pnand %p492_p6, %p172_p7 }
  0x16   : > { %176 = sbr.rel (%p173_p8) target bundleno = 767 (0x2ff), region = 36 }
  0x1b   : > { %p493_p9 = scmp.ne.s32.totalorder %s662_s23, 0 }
  0x1d   : > { %191 = sbr.rel (%p493_p9) target bundleno = 37 (0x25), region = 40 }
  0x22   : > { %vm192_vm0 = vcmask 261120   ;;  %vm194_vm1 = vcmask 7168   ;;  %v677_v0 = vmov 0.0  }
  0x23   : > { %193 = vst.msk [vmem:[#allocation2] sm:$0xff] %vm192_vm0, %v677_v0 }
  0x24   : > { %195 = vst.msk [vmem:[#allocation3] sm:$0xff] %vm194_vm1, %v677_v0 }
  0x25 PF: > { %s738_s27 = sshll.u32 %s662_s23, 2  ;;  %s740_s28 = smov 0  }
  0x26   : > { %832 = sst [smem:[#allocation10_spill]] %s738_s27 }
  0x27 LB: >> { %s833_s27 = sld [smem:[#allocation10_spill]]  ;;  %vm307_vm2 = vcmask 0   ;;  %vm301_vm3 = vcmask 253952   ;;  %s674_s28 = sphi %s740_s28, %s202_s28  }
  0x2d   : >> { %s205_s29 = sshra.s32 %s833_s27, 7  ;;  %s210_s30 = sand.u32 127, %s833_s27 }
  0x2e   : >> { %s207_s6 = sadd.s32 %s674_s28, %s205_s29  ;;  %s226_s7 = sadd.s32 1, %s833_s27 }
  0x2f   : >> { %s495_s8 = sshll.u32 %s207_s6, 7  ;;  %s227_s9 = sshra.s32 %s226_s7, 7 }
  0x30   : >> { %s211_s10 = sadd.s32 %s495_s8, %s210_s30  ;;  %s229_s11 = sadd.s32 %s674_s28, %s227_s9 }
  0x31   : >> { %s212_s12 = sld [smem:[#allocation5 + %s211_s10]]  ;;  %s501_s13 = sshll.u32 %s229_s11, 7 }
  0x32   : >> { %s232_s14 = sand.u32 127, %s226_s7  ;;  %s248_s15 = sadd.s32 2, %s833_s27 }
  0x33   : >> { %s233_s16 = sadd.s32 %s501_s13, %s232_s14  ;;  %s249_s17 = sshra.s32 %s248_s15, 7 }
  0x34   : >> { %s234_s18 = sld [smem:[#allocation5 + %s233_s16]]  ;;  %s251_s19 = sadd.s32 %s674_s28, %s249_s17 }
  0x35   : >> { %s507_s20 = sshll.u32 %s251_s19, 7  ;;  %s254_s21 = sand.u32 127, %s248_s15 }
  0x36   : >> { %s255_s22 = sadd.s32 %s507_s20, %s254_s21  ;;  %s270_s7 = sadd.s32 3, %s833_s27 }
  0x37   : >> { %p213_p10 = scmp.ne.s32.totalorder %s212_s12, 0  ;;  %p216_p11 = scmp.gt.s32.totalorder %s212_s12, 0 }
  0x38   : >> { %p496_p12 = scmp.lt.s32.totalorder %s212_s12, 49  ;;  %s256_s29 = sld [smem:[#allocation5 + %s255_s22]] }
  0x39   : >> { %s752_s6 = scalar_select %p213_p10, 1, 0 }
  0x3a   : >> { %s841_s12 = smov (!%p216_p11, %s212_s12), 0  ;;  %p235_p13 = scmp.ne.s32.totalorder %s234_s18, 0 }
  0x3b   : >> { %s843_s12 = smov (!%p496_p12, %s841_s12), 49  ;;  %p238_p0 = scmp.gt.s32.totalorder %s234_s18, 0 }
  0x3c   : >> { %s754_s30 = scalar_select %p235_p13, 1, 0 }
  0x3d   : >> { %p502_p1 = scmp.lt.s32.totalorder %s234_s18, 49  ;;  %s845_s18 = smov (!%p238_p0, %s234_s18), 0 }
  0x3e   : >> { %p257_p2 = scmp.ne.s32.totalorder %s256_s29, 0  ;;  %p260_p3 = scmp.gt.s32.totalorder %s256_s29, 0 }
  0x3f   : >> { %s847_s18 = smov (!%p502_p1, %s845_s18), 49  ;;  %s215_s9 = scvt.s32.f32 %s752_s6 }
  0x40   : >> { %s757_s8 = scalar_select %p257_p2, 1, 0 }
  0x41   : >> { %p508_p4 = scmp.lt.s32.totalorder %s256_s29, 49  ;;  %s220_s13 = scalar_lea.vmem %s826_s1, %s843_s12  ;;  %v222_v2 = vstv %s215_s9 }
  0x42   : >> { %s271_s14 = sshra.s32 %s270_s7, 7  ;;  %s849_s29 = smov (!%p260_p3, %s256_s29), 0  ;;  %v221_v1 = vld [vmem:[%s220_s13] sm:$0x1] }
  0x43   : >> { %s273_s15 = sadd.s32 %s674_s28, %s271_s14  ;;  %s276_s16 = sand.u32 127, %s270_s7  ;;  %v223_v5 = vmul.f32 %v222_v2, %v221_v1 }
  0x44   : >> { %s851_s29 = smov (!%p508_p4, %s849_s29), 49  ;;  %s237_s17 = scvt.s32.f32 %s754_s30 }
  0x45   : >> { %s513_s19 = sshll.u32 %s273_s15, 7  ;;  %s242_s22 = scalar_lea.vmem %s826_s1, %s847_s18 }
  0x46   : >> { %s277_s0 = sadd.s32 %s513_s19, %s276_s16  ;;  %v243_v3 = vld [vmem:[%s242_s22] sm:$0x1]  ;;  %v244_v4 = vstv %s237_s17  ;;  %s259_s6 = scvt.s32.f32 %s757_s8 }
  0x47   : >> { %s278_s27 = sld [smem:[#allocation5 + %s277_s0]]  ;;  %s264_s11 = scalar_lea.vmem %s826_s1, %s851_s29  ;;  %v245_v6 = vmul.f32 %v244_v4, %v243_v3 }
  0x48   : >> { %s293_s14 = sadd.f32 %s237_s17, %s215_s9  ;;  %v265_v7 = vld [vmem:[%s264_s11] sm:$0x1]  ;;  %v266_v8 = vstv %s259_s6  ;;  %s303_s29 = scalar_lea.vmem [#allocation3], %s674_s28 }
  0x49   : >> { %v267_v9 = vmul.f32 %v266_v8, %v265_v7  ;;  %v292_v10 = vadd.f32 %v245_v6, %v223_v5  ;;  %v304_v12 = vld [vmem:[%s303_s29] sm:$0x1]  ;;  %s298_s15 = scalar_lea.vmem [#allocation2], %s674_s28  ;;  %s202_s28 = sadd.s32 1, %s674_s28  }
  0x4a   : >> { %s295_s18 = sadd.f32 %s293_s14, %s259_s6  ;;  %v299_v18 = vld [vmem:[%s298_s15] sm:$0x1]  ;;  %p199_p8 = scmp.ge.s32.totalorder %s202_s28, 8  }
  0x4b   : >> { %v294_v13 = vadd.f32 %v292_v10, %v267_v9  ;;  %p519_p9 = scmp.ne.s32.totalorder (%p199_p8), %s662_s23, 1 }
  0x4d   : >> { %p279_p5 = scmp.ne.s32.totalorder %s278_s27, 0  ;;  %p282_p6 = scmp.gt.s32.totalorder %s278_s27, 0 }
  0x4e   : >> { %p514_p7 = scmp.lt.s32.totalorder %s278_s27, 49 }
  0x4f   : >> { %s280_s0 = scalar_select %p279_p5, 1, 0 }
  0x50   : >> { %s853_s27 = smov (!%p282_p6, %s278_s27), 0 }
  0x51   : >> { %s281_s30 = scvt.s32.f32 %s280_s0  ;;  %s855_s27 = smov (!%p514_p7, %s853_s27), 49 }
  0x52   : >> { %s286_s13 = scalar_lea.vmem %s826_s1, %s855_s27 }
  0x53   : >> { %v288_v11 = vstv %s281_s30  ;;  %s297_s7 = sadd.f32 %s295_s18, %s281_s30  ;;  %v287_v14 = vld [vmem:[%s286_s13] sm:$0x1] }
  0x54   : >> { %v289_v16 = vmul.f32 %v288_v11, %v287_v14 }
  0x55   : >> { %v305_v15 = vstv %s297_s7 }
  0x56   : >> { %v306_v17 = vadd.f32 %v305_v15, %v304_v12  ;;  %v296_v19 = vadd.f32 %v294_v13, %v289_v16  ;;  %201 = sbr.rel (!%p199_p8) target bundleno = 39 (0x27), region = 82 }
  0x58   : >> { %308 = vst.msk [vmem:[%s303_s29] sm:$0x1] %vm307_vm2, %v306_v17  ;;  %v300_v20 = vadd.f32 %v299_v18, %v296_v19 }
  0x5a   : >> { %302 = vst.msk [vmem:[%s298_s15] sm:$0x1] %vm301_vm3, %v300_v20 }
  0x5b   : > { %312 = sbr.rel (%p519_p9) target bundleno = 752 (0x2f0), region = 51 }
  0x60   : > { %v313_v21 = vld [vmem:[#allocation3] sm:$0xff]  ;;  %v334_v22 = vld [vmem:[%s828_s3 + $0x18] sm:$0xff]  ;;  %v678_v23 = vmov 0   ;;  %v679_v25 = vmov 0.0   ;;  %v333_v26 = vld [vmem:[%s828_s3 + $0x10] sm:$0xff]  ;;  %vm680_vm4 = vmmov 0   ;;  %v416_v35 = vlaneseq }
  0x61   : > { %595 = vset.pattern.permute.xlu0 %v678_v23  ;;  %v314_v24 = vmax.f32 %v313_v21, 1.0  ;;  %540 = vmatprep.subr.mxu0 %v679_v25  ;;  %v332_v27 = vld [vmem:[%s828_s3 + $0x8] sm:$0xff]  ;;  %v331_v28 = vld [vmem:[%s828_s3] sm:$0xff]  ;;  %vm342_vm5 = vcmask 261120  }
  0x62   : > { %541 = vmatpush3.msra.mxu0 %v334_v22  ;;  %548 = vmatprep.mubr.msk.f32.mxu0 %vm680_vm4, %v679_v25  ;;  %v315_v30 = vld [vmem:[#allocation2] sm:$0xff]  ;;  %v417_v36 = vand.u32 127, %v416_v35 }
  0x63   : > { %596 = vrcp.f32 %v314_v24  ;;  %542 = vmatprep.subr.mxu0 %v679_v25  ;;  %v520_v31 = vld [vmem:[%s827_s2] ss:$0 sm:$0xff] }
  0x64   : > { %543 = vmatpush3.msra.mxu0 %v333_v26  ;;  %v521_v37 = vld [vmem:[%s829_s4] ss:$0 sm:$0xff]  ;;  %vm418_vm6 = vcmp.lt.s32.totalorder %v417_v36, 5 }
  0x65   : > { %544 = vmatprep.subr.mxu0 %v679_v25 }
  0x66   : > { %545 = vmatpush3.msra.mxu0 %v332_v27 }
  0x67   : > { %546 = vmatprep.subr.mxu0 %v679_v25 }
  0x68   : > { %547 = vmatpush3.msra.mxu0 %v331_v28 }
  0x70   : > { %v597_v29 = vpop.eup %596 }
  0x71   : > { %319 = vperm.xlu0 %595, %v597_v29  }
  0xec   : > { %v320_v32 = vpop.permute.xlu0 %319 }
  0xed   : > { %v322_v33 = vmul.f32 %v320_v32, %v315_v30 }
  0xef   : > { %v330_v34 = vadd.f32 %v520_v31, %v322_v33 }
  0xf1   : > { %549 = vmatmul.mubr.msk.f32.vlgmr.msra.gmra.mxu0 %vm342_vm5, %v330_v34 }
 0x1b1   : > { %v412_v38 = vpop.f32.mrf.mxu0 }
 0x1b2   : > { %v413_v39 = vadd.f32 %v521_v37, %v412_v38 }
 0x1b3   : > { %v550_v40 = vpop.f32.mrf.mxu0 }
 0x1b4   : > { %v419_v41 = vsel %vm418_vm6, %v413_v39, -1e+30 }
 0x1b5   : > { %420 = vmax.xlane.f32.xlu0 %v419_v41 }
 0x23e   : > { %v421_v42 = vpop.xlane.xlu0 %420 }
 0x23f   : > { %v422_v43 = vsub.f32 %v419_v41, %v421_v42 }
 0x241   : > { %v423_v44 = vmul.f32 1.442695, %v422_v43 }
 0x243   : > { %598 = vpow2.f32 %v423_v44 }
 0x250   : > { %v599_v45 = vpop.eup %598 }
 0x251   : > { %425 = vadd.xlane.f32.xlu1 %v599_v45 }
 0x2da   : > { %v426_v46 = vpop.xlane.xlu1 %425 }
 0x2db   : > { %600 = vlog2.f32 %v426_v46 }
 0x2e8   : > { %v601_v47 = vpop.eup %600 }
 0x2e9   : > { %v428_v48 = vmul.f32 0.6931472, %v601_v47 }
 0x2eb   : > { %v429_v49 = vadd.f32 %v428_v48, %v421_v42 }
 0x2ed   : > { %v430_v50 = vsub.f32 %v419_v41, %v429_v49 }
 0x2ef   : > { %431 = vst [vmem:[#allocation6] sm:$0xff] %v430_v50 }
 0x2f0 PF: > { %s834_s11 = sadd.s32 4294967295, %s670_s25   ;;  %s681_s18 = smov [#allocation6]  }
 0x2f1   : > { %p801_p10 = scmp.eq.s32.totalorder %s834_s11, 1  ;;  %s441_s0 = sshll.u32 %s681_s18, 4  ;;  %s442_s0 = int_to_ptr.vmem [resolvable:$true] %s441_s0 }
 0x2f2   : > { %s614_s30 = scalar_lea.vmem %s442_s0, 128  ;;  %p621_p0 = scmp.lt.s32.totalorder %s442_s0, %s442_s0 }
 0x2f3   : > { %p615_p11 = scmp.ne.s32.totalorder %s442_s0, %s614_s30  ;;  %p622_p1 = scmp.lt.s32.totalorder %s614_s30, %s614_s30 }
 0x2f5   : > { %p616_p12 = pnand %p615_p11, %p801_p10  ;;  %p623_p2 = por %p622_p1, %p621_p0 }
 0x2f7   : > { %p617_p13 = pneg %p616_p12 }
 0x2f9   : > { %p624_p3 = pnand %p623_p2, %p617_p13 }
 0x2fb   : > { %627 = shalt.err (!%p624_p3)
}
 0x2fc   : > { %552 = dma.vmem_to_hbm [thread:$0]  (%p801_p10), %s442_s0, 128, %s830_s5, [#allocation7]  }
 0x2fd   : > { %657 = dma.done.wait (%p801_p10), [#allocation7], 128  }
 0x2fe   : > { %659 = vsyncadd (%p801_p10), [#allocation7], 4294967168 }
 0x2ff PF: > { %s22_s25 = sadd.s32 1, %s670_s25   ;;  %s836_s23 = smov %s666_s24 }
 0x300   : > { %p19_p4 = scmp.ge.s32.totalorder %s22_s25, 4   ;;  %s837_s24 = smov %s839_s26 }
 0x302   :  { %21 = sbr.rel (!%p19_p4) target bundleno = 17 (0x11), region = 93 }
 0x307   :  { %454 = vsyncpa [#allocation7], 1 }
 0x308   :  { %456 = vsyncpa [#allocation7 + $0x1], 1 }

</bundles_post_ra>
